<compile_context>
chip_gen: v6e
topology: v6e:2x2x1
jax: 0.10.0
libtpu: 0.0.40
codegen_flags: <defaults>
</compile_context>

<pallas_src>
import jax
import jax.numpy as jnp
from jax.experimental import pallas as pl
from jax.experimental.pallas import tpu as pltpu


def _minus_kernel(a_ref, b_ref, o_ref):
    # Elementwise subtraction of the current (rows_per_tile, lanes) tile (VPU).
    o_ref[...] = a_ref[...] - b_ref[...]


# Row granule: multiple of the sublane packing for f32(8)/bf16(16)/int8(32).
_ROW_GRANULE = 32
# ~2 MiB per block per array: 3 streams x 2 pipeline buffers = 12 MiB live
# VMEM -> fits every generation's default scoped VMEM (v5e 16 MiB, v6e/v7x
# 32 MiB) while sitting on the HBM-roofline plateau for elementwise streaming.
_TARGET_TILE_BYTES = 2 * 1024 * 1024


def _round_up(x: int, m: int) -> int:
    return -(-x // m) * m


def minus_layer_pallas(conv1_input: jax.Array, conv2_output: jax.Array) -> jax.Array:
    """Elementwise `conv1_input - conv2_output` computed in a Pallas TPU kernel."""
    assert conv1_input.shape == conv2_output.shape
    assert conv1_input.dtype == conv2_output.dtype

    orig_shape = conv1_input.shape
    total = conv1_input.size
    itemsize = jnp.dtype(conv1_input.dtype).itemsize

    # Fast path: widest lane-dense slab width (multiple of 128) that divides
    # the flat size -> no padding and no post-slice (no extra HBM round-trips).
    lanes = None
    for cand in (1024, 512, 256, 128):
        if total % cand == 0:
            lanes = cand
            break

    a_flat = jnp.ravel(conv1_input)
    b_flat = jnp.ravel(conv2_output)
    if lanes is None:
        # Slow path (flat size not a multiple of 128): pad up to 8*128.
        lanes = 128
        padded_total = _round_up(total, 8 * lanes)
        pad = padded_total - total
        a_flat = jnp.pad(a_flat, (0, pad))
        b_flat = jnp.pad(b_flat, (0, pad))
    else:
        padded_total = total

    rows = padded_total // lanes
    a2d = a_flat.reshape(rows, lanes)
    b2d = b_flat.reshape(rows, lanes)

    # Block row count: ~_TARGET_TILE_BYTES per array, multiple of _ROW_GRANULE.
    target_rows = max(
        _ROW_GRANULE,
        (_TARGET_TILE_BYTES // (lanes * itemsize)) // _ROW_GRANULE * _ROW_GRANULE,
    )
    if rows <= 2 * _ROW_GRANULE:
        # Tiny input: one full-extent block (allowed even if rows % 8 != 0).
        rows_per_tile = rows
    else:
        # Keep at least 2 grid steps so v7x's two TensorCores both get work.
        half_rows = _round_up(_round_up(rows, 2) // 2, _ROW_GRANULE)
        rows_per_tile = min(target_rows, half_rows)

    grid = (pl.cdiv(rows, rows_per_tile),)

    out2d = pl.pallas_call(
        _minus_kernel,
        out_shape=jax.ShapeDtypeStruct((rows, lanes), conv1_input.dtype),
        grid_spec=pltpu.PrefetchScalarGridSpec(
            num_scalar_prefetch=0,
            grid=grid,
            in_specs=[
                pl.BlockSpec((rows_per_tile, lanes), lambda i: (i, 0)),
                pl.BlockSpec((rows_per_tile, lanes), lambda i: (i, 0)),
            ],
            out_specs=pl.BlockSpec((rows_per_tile, lanes), lambda i: (i, 0)),
        ),
        compiler_params=pltpu.CompilerParams(
            dimension_semantics=("parallel",),
        ),
    )(a2d, b2d)

    if padded_total != total:
        out_flat = out2d.reshape(-1)[:total]
        return out_flat.reshape(orig_shape)
    return out2d.reshape(orig_shape)


def minus_layer_forward(x: dict) -> dict:
    """Dict-in / dict-out semantics matching the PyTorch MinusLayer.forward."""
    minus_input = x["conv1_input"]
    conv2_output = x["conv2_output"]
    x["minus_output"] = minus_layer_pallas(minus_input, conv2_output)
    return x


if __name__ == "__main__":
    key = jax.random.PRNGKey(0)
    k1, k2 = jax.random.split(key)

    # Small NCHW shapes consistent with the conv tensors the layer consumes.
    N, C, H, W = 2, 4, 16, 16
    conv1_input = jax.random.normal(k1, (N, C, H, W), dtype=jnp.float32)
    conv2_output = jax.random.normal(k2, (N, C, H, W), dtype=jnp.float32)

    x = {"conv1_input": conv1_input, "conv2_output": conv2_output}
    x = minus_layer_forward(x)
    out = jax.block_until_ready(x["minus_output"])

    # Correctness check against the reference elementwise subtraction.
    ref = conv1_input - conv2_output
    assert out.shape == ref.shape
    assert out.dtype == ref.dtype
    assert jnp.allclose(out, ref, atol=1e-6, rtol=1e-6)

    print("KERNEL_OK")
</pallas_src>

<mosaic_0001>
module attributes {stable_mosaic.version = 11 : i64} {
  func.func @_minus_kernel(%arg0: i32, %arg1: memref<2x1024xf32, #tpu.memory_space<vmem>>, %arg2: memref<2x1024xf32, #tpu.memory_space<vmem>>, %arg3: memref<2x1024xf32, #tpu.memory_space<vmem>>) attributes {dimension_semantics = [#tpu.dimension_semantics<parallel>], iteration_bounds = array<i64: 1>, scalar_prefetch = 0 : i64, scratch_operands = 0 : i64, tpu.core_type = #tpu.core_type<tc>, window_params = [{transform_indices = @transform_0, window_bounds = array<i64: 2, 1024>}, {transform_indices = @transform_1, window_bounds = array<i64: 2, 1024>}, {transform_indices = @transform_2, window_bounds = array<i64: 2, 1024>}]} {
    %c0 = arith.constant 0 : index
    %c0_0 = arith.constant 0 : index
    %0 = vector.load %arg1[%c0, %c0_0] : memref<2x1024xf32, #tpu.memory_space<vmem>>, vector<2x1024xf32>
    %c0_1 = arith.constant 0 : index
    %c0_2 = arith.constant 0 : index
    %1 = vector.load %arg2[%c0_1, %c0_2] : memref<2x1024xf32, #tpu.memory_space<vmem>>, vector<2x1024xf32>
    %2 = arith.subf %0, %1 : vector<2x1024xf32>
    %c0_3 = arith.constant 0 : index
    %c0_4 = arith.constant 0 : index
    %3 = vector.load %arg3[%c0_3, %c0_4] : memref<2x1024xf32, #tpu.memory_space<vmem>>, vector<2x1024xf32>
    tpu.vector_store %arg3[%c0_3, %c0_4], %2 {strides = array<i32>} : memref<2x1024xf32, #tpu.memory_space<vmem>>, vector<2x1024xf32>,
    return
  }
  func.func @transform_0(%arg0: i32) -> (i32, i32) {
    %c0_i32 = arith.constant 0 : i32
    %c0_i32_0 = arith.constant 0 : i32
    return %arg0, %c0_i32 : i32, i32
  }
  func.func @transform_1(%arg0: i32) -> (i32, i32) {
    %c0_i32 = arith.constant 0 : i32
    %c0_i32_0 = arith.constant 0 : i32
    return %arg0, %c0_i32 : i32, i32
  }
  func.func @transform_2(%arg0: i32) -> (i32, i32) {
    %c0_i32 = arith.constant 0 : i32
    %c0_i32_0 = arith.constant 0 : i32
    return %arg0, %c0_i32 : i32, i32
  }
}

</mosaic_0001>

<bundles_post_ra>
// kernel: tpu_custom_call.1
= control target key start
LH: loop header
LB: loop body
LE: loop exit
PB: predicated region body
PF: predicated region fallthrough
CT: control target
= control target key end

     0   :  { %7 = vsyncpa [#allocation3], 0  ;;  %s156_s0 = inlined_call_operand.hbm [shape: f32[2,1024], index: 0, kind: input, shape index: {}]   ;;  %s157_s1 = inlined_call_operand.hbm [shape: f32[2,1024], index: 1, kind: input, shape index: {}]   ;;  %s158_s2 = inlined_call_operand.hbm [shape: f32[2,1024], index: 2, kind: output, shape index: {}]  }
   0x1   :  { %8 = vsyncpa [#allocation6], 0 }
   0x2   :  { %9 = vsyncpa [#allocation4], 0  ;;  %s129_s9 = smov [#allocation2]   ;;  %s130_s11 = smov [#allocation5]  }
   0x3   :  { %s16_s10 = sshll.u32 %s129_s9, 4  ;;  %s26_s12 = sshll.u32 %s130_s11, 4  ;;  %s17_s10 = int_to_ptr.vmem [resolvable:$true] %s16_s10  ;;  %s27_s12 = int_to_ptr.vmem [resolvable:$true] %s26_s12 }
   0x4   :  { %s71_s13 = scalar_lea.vmem %s17_s10, 256  ;;  %p76_p1 = scmp.lt.s32.totalorder %s17_s10, %s17_s10 }
   0x5   :  { %p72_p0 = scmp.ne.s32.totalorder %s17_s10, %s71_s13  ;;  %p77_p2 = scmp.lt.s32.totalorder %s71_s13, %s71_s13 }
   0x7   :  { %p78_p3 = por %p77_p2, %p76_p1 }
   0x9   :  { %p79_p4 = pnand %p78_p3, %p72_p0 }
   0xb   :  { %82 = shalt.err (!%p79_p4)
}
   0xc   :  { %19 = dma.hbm_to_vmem [thread:$0]  %s156_s0, 256, %s17_s10, [#allocation3]  }
   0xd   :  { %s91_s16 = scalar_lea.vmem %s27_s12, 256  ;;  %p96_p6 = scmp.lt.s32.totalorder %s27_s12, %s27_s12 }
   0xe   :  { %p92_p5 = scmp.ne.s32.totalorder %s27_s12, %s91_s16  ;;  %p97_p7 = scmp.lt.s32.totalorder %s91_s16, %s91_s16 }
  0x10   :  { %p98_p8 = por %p97_p7, %p96_p6 }
  0x12   :  { %p99_p9 = pnand %p98_p8, %p92_p5 }
  0x14   :  { %102 = shalt.err (!%p99_p9)
}
  0x15   :  { %29 = dma.hbm_to_vmem [thread:$0]  %s157_s1, 256, %s27_s12, [#allocation6]  }
  0x16   :  { %123 = dma.done.wait [#allocation3], 256  }
  0x17   :  { %124 = vsyncadd [#allocation3], 4294967040 }
  0x18   :  { %125 = dma.done.wait [#allocation6], 256  }
  0x19   :  { %126 = vsyncadd [#allocation6], 4294967040  ;;  %s131_s19 = smov [#allocation7]   ;;  %v36_v0 = vld [vmem:[#allocation2] sm:$0xff]  ;;  %v38_v1 = vld [vmem:[#allocation5] sm:$0xff] }
  0x1a   :  { %s50_s20 = sshll.u32 %s131_s19, 4  ;;  %v37_v2 = vld [vmem:[#allocation2 + $0x8] sm:$0xff]  ;;  %v40_v3 = vsub.f32 %v36_v0, %v38_v1  ;;  %v39_v4 = vld [vmem:[#allocation5 + $0x8] sm:$0xff]  ;;  %s51_s20 = int_to_ptr.vmem [resolvable:$true] %s50_s20 }
  0x1b   :  { %v41_v5 = vsub.f32 %v37_v2, %v39_v4  ;;  %s103_s0 = scalar_lea.vmem %s51_s20, 256  ;;  %p108_p11 = scmp.lt.s32.totalorder %s51_s20, %s51_s20 }
  0x1c   :  { %42 = vst [vmem:[#allocation7] sm:$0xff] %v40_v3  ;;  %p104_p10 = scmp.ne.s32.totalorder %s51_s20, %s103_s0  ;;  %p109_p12 = scmp.lt.s32.totalorder %s103_s0, %s103_s0 }
  0x1d   :  { %43 = vst [vmem:[#allocation7 + $0x8] sm:$0xff] %v41_v5 }
  0x1e   :  { %p110_p13 = por %p109_p12, %p108_p11 }
  0x20   :  { %p111_p0 = pnand %p110_p13, %p104_p10 }
  0x22   :  { %114 = shalt.err (!%p111_p0)
}
  0x23   :  { %53 = dma.vmem_to_hbm [thread:$0]  %s51_s20, 256, %s158_s2, [#allocation4]  }
  0x24   :  { %127 = dma.done.wait [#allocation4], 256  }
  0x25   :  { %128 = vsyncadd [#allocation4], 4294967040 }
  0x26   :  { %57 = vsyncpa [#allocation3], 1 }
  0x27   :  { %58 = vsyncpa [#allocation6], 1 }
  0x28   :  { %59 = vsyncpa [#allocation4], 1 }

</bundles_post_ra>
